<compile_context>
chip_gen: v6e
topology: v6e:2x2x1
jax: 0.10.0
libtpu: 0.0.40
codegen_flags: <defaults>
</compile_context>

<pallas_src>
import functools

import jax
import jax.numpy as jnp
from jax import lax
from jax.experimental import pallas as pl
from jax.experimental.pallas import tpu as pltpu

NEG_BIG = -9.0e15  # matches -9000000000000000.0 in the PyTorch module


def _vmem_capacity_bytes():
    """Physical VMEM of the local TPU generation (fallback: v7x's 64 MiB)."""
    try:
        info = pltpu.get_tpu_info()
        cap = getattr(info, "vmem_capacity_bytes", None)
        if cap:
            return int(cap)
    except Exception:
        pass
    return 64 << 20


def _prop_rows(adj_rows, feats_full, old_rows, *, exact_mask):
    """Propagate one block of rows.

    adj_rows:   (m, n) raw adjacency rows (any dtype, binarized here).
    feats_full: (n, d) f32 features from the previous step.
    old_rows:   (m, d) f32 previous features of these m rows (kept when deg==0).
    """
    bin_f32 = (adj_rows > 0).astype(jnp.float32)
    deg = jnp.sum(bin_f32, axis=1, keepdims=True)          # exact integer degree in f32

    # MXU in bf16: {0,1} is exact in bf16; features use a two-term hi+lo bf16
    # split (2 native bf16 passes vs ~3x-emulated f32, error ~1.5e-5 relative).
    bin_bf = bin_f32.astype(jnp.bfloat16)
    hi = feats_full.astype(jnp.bfloat16)
    lo = (feats_full - hi.astype(jnp.float32)).astype(jnp.bfloat16)
    prop = (jnp.dot(bin_bf, hi, preferred_element_type=jnp.float32)
            + jnp.dot(bin_bf, lo, preferred_element_type=jnp.float32))

    scale = pl.reciprocal(jnp.maximum(deg, 1.0), approx=False)   # guard isolated rows
    if exact_mask:
        # Reference mask is sum(adj) > 0; only differs from deg > 0 when the
        # adjacency has negative entries.
        mask = jnp.sum(adj_rows.astype(jnp.float32), axis=1, keepdims=True) > 0
    else:
        mask = deg > 0
    return jnp.where(mask, prop * scale, old_rows)


# ----------------------------------------------------------------------------- kernels
def _collapsed_kernel(adj_ref, feat_ref, out_ref, *, exact_mask, unroll):
    """All L propagation steps inside a single grid iteration (small graphs)."""
    L = adj_ref.shape[0]
    feats0 = feat_ref[...].astype(jnp.float32)

    def body(l, feats):
        return _prop_rows(adj_ref[l], feats, feats, exact_mask=exact_mask)

    out_ref[...] = lax.fori_loop(0, L, body, feats0, unroll=unroll)


def _streamed_kernel(adj_ref, feat_ref, out_ref, *, exact_mask):
    """One adjacency per grid step; feature carry lives in out_ref (VMEM resident)."""
    @pl.when(pl.program_id(0) == 0)
    def _():
        out_ref[...] = feat_ref[...].astype(jnp.float32)

    feats = out_ref[...]
    out_ref[...] = _prop_rows(adj_ref[...], feats, feats, exact_mask=exact_mask)


def _row_step(adj_ref, src_ref, dst_ref, out_ref, row0, tm, exact_mask):
    old = src_ref[pl.ds(row0, tm), :]
    res = _prop_rows(adj_ref[...], src_ref[...], old, exact_mask=exact_mask)
    dst_ref[pl.ds(row0, tm), :] = res
    out_ref[...] = res


def _row_tiled_kernel(adj_ref, feat_ref, out_ref, fea_a, fea_b, *, exact_mask):
    """Row-tiled streamed path: grid (L, n/tm), ping-pong full-feature carry."""
    l = pl.program_id(0)
    i = pl.program_id(1)
    tm = out_ref.shape[0]
    row0 = pl.multiple_of(i * tm, tm)

    @pl.when(jnp.logical_and(l == 0, i == 0))
    def _():
        fea_b[...] = feat_ref[...].astype(jnp.float32)

    # Even steps read fea_b / write fea_a; odd steps swap. All row tiles of step
    # l-1 finish before step l starts (i is the inner grid axis), so the source
    # buffer is always fully written before it is read.
    @pl.when(l % 2 == 0)
    def _():
        _row_step(adj_ref, fea_b, fea_a, out_ref, row0, tm, exact_mask)

    @pl.when(l % 2 == 1)
    def _():
        _row_step(adj_ref, fea_a, fea_b, out_ref, row0, tm, exact_mask)


# ----------------------------------------------------------------------------- wrapper
def propagation_net_param_free(features, adj_stack, *,
                               assume_nonnegative_adj=True,
                               vmem_budget_bytes=None,
                               row_tile=None,
                               _force_path=None):
    """features: (n_node, fea_dim); adj_stack: (L, n_node, n_node), any dtype."""
    n_node, fea_dim = features.shape
    L = adj_stack.shape[0]
    exact_mask = not assume_nonnegative_adj

    # Lane-dense feature/output columns (unmasked stores, full MXU N). Rows stay
    # unpadded on the collapsed/streamed paths so the dominant adjacency tensor
    # is never copied in the wrapper (full-extent blocks satisfy the (8,128) rule).
    d_pad = -(-fea_dim // 128) * 128
    feat_in = features if d_pad == fea_dim else jnp.pad(
        features, ((0, 0), (0, d_pad - fea_dim)))

    adj_isz = jnp.dtype(adj_stack.dtype).itemsize
    feat_isz = jnp.dtype(feat_in.dtype).itemsize

    cap = _vmem_capacity_bytes()
    if vmem_budget_bytes is None:
        # ~70% of physical VMEM: ~90 MiB on v5e/v6e (128 MiB), ~45 MiB on v7x (64 MiB).
        vmem_budget_bytes = int(cap * 0.70)

    # VMEM footprint estimates (feature/output blocks single-buffered, adjacency
    # double-buffered on streamed paths, plus in-kernel bf16/f32 temporaries).
    fd_bytes = n_node * d_pad * feat_isz
    od_bytes = n_node * d_pad * 4
    tmp_bytes = n_node * n_node * 2 + n_node * d_pad * 16
    collapsed_bytes = L * n_node * n_node * adj_isz + fd_bytes + od_bytes + tmp_bytes
    streamed_bytes = 2 * n_node * n_node * adj_isz + fd_bytes + od_bytes + tmp_bytes

    if _force_path is not None:
        path = _force_path
    elif collapsed_bytes <= vmem_budget_bytes:
        path = "collapsed"
    elif streamed_bytes <= vmem_budget_bytes:
        path = "streamed"
    else:
        path = "row_tiled"

    out_rows = n_node

    if path == "collapsed":
        # Whole (L, n, n) stack in VMEM; single grid step => Buffered(1) everywhere
        # (double buffering would only double the footprint with zero overlap).
        need_bytes = collapsed_bytes
        grid_spec = pltpu.PrefetchScalarGridSpec(
            num_scalar_prefetch=0,
            grid=(1,),
            in_specs=[
                pl.BlockSpec((L, n_node, n_node), lambda i: (0, 0, 0),
                             pipeline_mode=pl.Buffered(1)),
                pl.BlockSpec((n_node, d_pad), lambda i: (0, 0),
                             pipeline_mode=pl.Buffered(1)),
            ],
            out_specs=pl.BlockSpec((n_node, d_pad), lambda i: (0, 0),
                                   pipeline_mode=pl.Buffered(1)),
        )
        kernel = functools.partial(_collapsed_kernel, exact_mask=exact_mask,
                                   unroll=L <= 8)
        dims = ("arbitrary",)
        operands = (adj_stack, feat_in)

    elif path == "streamed":
        # One (n, n) adjacency per grid step (double-buffered DMA); the feature
        # carry lives in the constant-index output block, so feature/output blocks
        # are single-buffered to free VMEM for the adjacency buffers.
        need_bytes = streamed_bytes
        grid_spec = pltpu.PrefetchScalarGridSpec(
            num_scalar_prefetch=0,
            grid=(L,),
            in_specs=[
                pl.BlockSpec((pl.Squeezed(), n_node, n_node), lambda l: (l, 0, 0)),
                pl.BlockSpec((n_node, d_pad), lambda l: (0, 0),
                             pipeline_mode=pl.Buffered(1)),
            ],
            out_specs=pl.BlockSpec((n_node, d_pad), lambda l: (0, 0),
                                   pipeline_mode=pl.Buffered(1)),
        )
        kernel = functools.partial(_streamed_kernel, exact_mask=exact_mask)
        dims = ("arbitrary",)
        operands = (adj_stack, feat_in)

    else:  # row_tiled — large n where even a single (n, n) slice does not fit.
        if row_tile is not None:
            tm = int(row_tile)
        else:
            tm = 8
            for cand in (512, 256, 128, 64, 32, 16, 8):
                n_cand = -(-n_node // cand) * cand
                need = (2 * cand * n_cand * adj_isz      # adjacency row-tile double buffer
                        + 2 * n_cand * d_pad * 4         # ping/pong feature carry
                        + n_cand * d_pad * feat_isz      # resident feature block
                        + 2 * cand * d_pad * 4           # output double buffer
                        + cand * n_cand * 2 + cand * d_pad * 16)
                if need <= vmem_budget_bytes:
                    tm = cand
                    break
        n_pad = -(-n_node // tm) * tm
        need_bytes = (2 * tm * n_pad * adj_isz + 2 * n_pad * d_pad * 4
                      + n_pad * d_pad * feat_isz + 2 * tm * d_pad * 4
                      + tm * n_pad * 2 + tm * d_pad * 16)
        # Row/column padding only in this large-n regime; padded rows have zero
        # degree so they keep their zero features and never pollute real rows.
        if n_pad != n_node:
            adj_rt = jnp.pad(adj_stack,
                             ((0, 0), (0, n_pad - n_node), (0, n_pad - n_node)))
            feat_rt = jnp.pad(feat_in, ((0, n_pad - n_node), (0, 0)))
        else:
            adj_rt = adj_stack
            feat_rt = feat_in
        grid_spec = pltpu.PrefetchScalarGridSpec(
            num_scalar_prefetch=0,
            grid=(L, n_pad // tm),
            in_specs=[
                pl.BlockSpec((pl.Squeezed(), tm, n_pad), lambda l, i: (l, i, 0)),
                pl.BlockSpec((n_pad, d_pad), lambda l, i: (0, 0),
                             pipeline_mode=pl.Buffered(1)),
            ],
            out_specs=pl.BlockSpec((tm, d_pad), lambda l, i: (i, 0)),
            scratch_shapes=[pltpu.VMEM((n_pad, d_pad), jnp.float32),
                            pltpu.VMEM((n_pad, d_pad), jnp.float32)],
        )
        kernel = functools.partial(_row_tiled_kernel, exact_mask=exact_mask)
        dims = ("arbitrary", "arbitrary")
        operands = (adj_rt, feat_rt)
        out_rows = n_pad

    vmem_limit = int(min(max(need_bytes * 1.3, 32 << 20), cap * 0.9))

    out_p = pl.pallas_call(
        kernel,
        out_shape=jax.ShapeDtypeStruct((out_rows, d_pad), jnp.float32),
        grid_spec=grid_spec,
        compiler_params=pltpu.CompilerParams(
            dimension_semantics=dims,
            vmem_limit_bytes=vmem_limit,
        ),
    )(*operands)

    return out_p[:n_node, :fea_dim].astype(features.dtype)


# ----------------------------------------------------------------------------- reference
def _reference(features, adj_stack):
    """Pure-JAX reference reproducing the PyTorch semantics exactly."""
    feats = features.astype(jnp.float32)
    for i in range(adj_stack.shape[0]):
        adj = adj_stack[i]
        n = feats.shape[0]
        raw = jnp.ones((n, n), jnp.float32)
        zero_vec = NEG_BIG * jnp.ones_like(raw)
        att = jnp.where(adj > 0, raw, zero_vec)
        att = jax.nn.softmax(att, axis=1)
        prop = att @ feats
        adj_num = jnp.sum(adj, axis=1)
        mask = jnp.where(adj_num > 0, 1.0, 0.0).astype(jnp.float32)
        feats = mask[:, None] * prop + (1.0 - mask)[:, None] * feats
    return feats


if __name__ == "__main__":
    key = jax.random.PRNGKey(0)
    k1, k2 = jax.random.split(key)

    n_node, fea_dim, n_adj = 16, 32, 3

    features = jax.random.normal(k1, (n_node, fea_dim), dtype=jnp.float32)

    # Deterministic binary adjacencies; zero out one row so the keep-old-features
    # branch (degree == 0) is exercised.
    adj_stack = (jax.random.uniform(k2, (n_adj, n_node, n_node)) > 0.6).astype(jnp.float32)
    adj_stack = adj_stack.at[0, n_node - 1, :].set(0.0)

    ref = _reference(features, adj_stack)

    # Default (collapsed) path.
    out_fast = jax.block_until_ready(propagation_net_param_free(features, adj_stack))
    assert jnp.allclose(out_fast, ref, atol=1e-4, rtol=1e-4), "collapsed path mismatch"

    # Exact reference mask (sum(adj) > 0) variant.
    out_exact = jax.block_until_ready(
        propagation_net_param_free(features, adj_stack, assume_nonnegative_adj=False))
    assert jnp.allclose(out_exact, ref, atol=1e-4, rtol=1e-4), "exact-mask path mismatch"

    # Streamed path (grid=(L,) carry in out_ref).
    out_stream = jax.block_until_ready(
        propagation_net_param_free(features, adj_stack, _force_path="streamed"))
    assert jnp.allclose(out_stream, ref, atol=1e-4, rtol=1e-4), "streamed path mismatch"

    # Row-tiled path, multiple row tiles (no padding).
    out_rows = jax.block_until_ready(
        propagation_net_param_free(features, adj_stack, _force_path="row_tiled", row_tile=8))
    assert jnp.allclose(out_rows, ref, atol=1e-4, rtol=1e-4), "row-tiled path mismatch"

    # Row-tiled path with padded rows (tm > n_node).
    out_rows_pad = jax.block_until_ready(
        propagation_net_param_free(features, adj_stack, _force_path="row_tiled", row_tile=32))
    assert jnp.allclose(out_rows_pad, ref, atol=1e-4, rtol=1e-4), "row-tiled(pad) path mismatch"

    print("KERNEL_OK")
</pallas_src>

<mosaic_0001>
module attributes {stable_mosaic.version = 11 : i64} {
  func.func @_collapsed_kernel(%arg0: i32, %arg1: memref<3x16x16xf32, #tpu.memory_space<vmem>>, %arg2: memref<16x128xf32, #tpu.memory_space<vmem>>, %arg3: memref<16x128xf32, #tpu.memory_space<vmem>>) attributes {dimension_semantics = [#tpu.dimension_semantics<arbitrary>], iteration_bounds = array<i64: 1>, scalar_prefetch = 0 : i64, scratch_operands = 0 : i64, tpu.core_type = #tpu.core_type<tc>, window_params = [{pipeline_mode = #tpu.pipeline_mode<synchronous>, transform_indices = @transform_0, window_bounds = array<i64: 3, 16, 16>}, {pipeline_mode = #tpu.pipeline_mode<synchronous>, transform_indices = @transform_1, window_bounds = array<i64: 16, 128>}, {pipeline_mode = #tpu.pipeline_mode<synchronous>, transform_indices = @transform_2, window_bounds = array<i64: 16, 128>}]} {
    %c0 = arith.constant 0 : index
    %c0_0 = arith.constant 0 : index
    %0 = vector.load %arg2[%c0, %c0_0] : memref<16x128xf32, #tpu.memory_space<vmem>>, vector<16x128xf32>
    %c0_i32 = arith.constant 0 : i32
    %1 = arith.index_cast %c0_i32 : i32 to index
    %c0_1 = arith.constant 0 : index
    %c0_2 = arith.constant 0 : index
    %2 = vector.load %arg1[%1, %c0_1, %c0_2] : memref<3x16x16xf32, #tpu.memory_space<vmem>>, vector<1x16x16xf32>
    %3 = vector.shape_cast %2 : vector<1x16x16xf32> to vector<16x16xf32>
    %cst = arith.constant 0.000000e+00 : f32
    %4 = vector.broadcast %cst : f32 to vector<16x16xf32>
    %5 = arith.cmpf ogt, %3, %4 : vector<16x16xf32>
    %6 = arith.extui %5 : vector<16x16xi1> to vector<16x16xi32>
    %7 = arith.sitofp %6 : vector<16x16xi32> to vector<16x16xf32>
    %cst_3 = arith.constant dense<0.000000e+00> : vector<16xf32>
    %8 = vector.multi_reduction <add>, %7, %cst_3 [1] : vector<16x16xf32> to vector<16xf32>
    %9 = vector.shape_cast %8 : vector<16xf32> to vector<16x1xf32>
    %10 = arith.truncf %7 : vector<16x16xf32> to vector<16x16xbf16>
    %11 = arith.truncf %0 : vector<16x128xf32> to vector<16x128xbf16>
    %12 = arith.extf %11 : vector<16x128xbf16> to vector<16x128xf32>
    %13 = arith.subf %0, %12 : vector<16x128xf32>
    %14 = arith.truncf %13 : vector<16x128xf32> to vector<16x128xbf16>
    %cst_4 = arith.constant dense<0.000000e+00> : vector<16x128xf32>
    %15 = tpu.matmul %10, %11, %cst_4 {dimension_numbers = #tpu.dot_dimension_numbers<[1], [0], [0], [1], [0, 0, 1, 1], [], []>} : vector<16x16xbf16>, vector<16x128xbf16>, vector<16x128xf32> -> vector<16x128xf32>
    %cst_5 = arith.constant dense<0.000000e+00> : vector<16x128xf32>
    %16 = tpu.matmul %10, %14, %cst_5 {dimension_numbers = #tpu.dot_dimension_numbers<[1], [0], [0], [1], [0, 0, 1, 1], [], []>} : vector<16x16xbf16>, vector<16x128xbf16>, vector<16x128xf32> -> vector<16x128xf32>
    %17 = arith.addf %15, %16 : vector<16x128xf32>
    %cst_6 = arith.constant 1.000000e+00 : f32
    %18 = vector.broadcast %cst_6 : f32 to vector<16x1xf32>
    %19 = arith.maximumf %9, %18 : vector<16x1xf32>
    %20 = tpu.reciprocal %19 : vector<16x1xf32> -> vector<16x1xf32>
    %cst_7 = arith.constant 0.000000e+00 : f32
    %21 = vector.broadcast %cst_7 : f32 to vector<16x1xf32>
    %22 = arith.cmpf ogt, %9, %21 : vector<16x1xf32>
    %23 = vector.broadcast %20 : vector<16x1xf32> to vector<16x128xf32>
    %24 = arith.mulf %17, %23 : vector<16x128xf32>
    %25 = vector.shape_cast %22 : vector<16x1xi1> to vector<16x1xi1>
    %26 = vector.broadcast %25 : vector<16x1xi1> to vector<16x128xi1>
    %27 = arith.select %26, %24, %0 : vector<16x128xi1>, vector<16x128xf32>
    %c1_i32 = arith.constant 1 : i32
    %28 = arith.index_cast %c1_i32 : i32 to index
    %c0_8 = arith.constant 0 : index
    %c0_9 = arith.constant 0 : index
    %29 = vector.load %arg1[%28, %c0_8, %c0_9] : memref<3x16x16xf32, #tpu.memory_space<vmem>>, vector<1x16x16xf32>
    %30 = vector.shape_cast %29 : vector<1x16x16xf32> to vector<16x16xf32>
    %cst_10 = arith.constant 0.000000e+00 : f32
    %31 = vector.broadcast %cst_10 : f32 to vector<16x16xf32>
    %32 = arith.cmpf ogt, %30, %31 : vector<16x16xf32>
    %33 = arith.extui %32 : vector<16x16xi1> to vector<16x16xi32>
    %34 = arith.sitofp %33 : vector<16x16xi32> to vector<16x16xf32>
    %cst_11 = arith.constant dense<0.000000e+00> : vector<16xf32>
    %35 = vector.multi_reduction <add>, %34, %cst_11 [1] : vector<16x16xf32> to vector<16xf32>
    %36 = vector.shape_cast %35 : vector<16xf32> to vector<16x1xf32>
    %37 = arith.truncf %34 : vector<16x16xf32> to vector<16x16xbf16>
    %38 = arith.truncf %27 : vector<16x128xf32> to vector<16x128xbf16>
    %39 = arith.extf %38 : vector<16x128xbf16> to vector<16x128xf32>
    %40 = arith.subf %27, %39 : vector<16x128xf32>
    %41 = arith.truncf %40 : vector<16x128xf32> to vector<16x128xbf16>
    %cst_12 = arith.constant dense<0.000000e+00> : vector<16x128xf32>
    %42 = tpu.matmul %37, %38, %cst_12 {dimension_numbers = #tpu.dot_dimension_numbers<[1], [0], [0], [1], [0, 0, 1, 1], [], []>} : vector<16x16xbf16>, vector<16x128xbf16>, vector<16x128xf32> -> vector<16x128xf32>
    %cst_13 = arith.constant dense<0.000000e+00> : vector<16x128xf32>
    %43 = tpu.matmul %37, %41, %cst_13 {dimension_numbers = #tpu.dot_dimension_numbers<[1], [0], [0], [1], [0, 0, 1, 1], [], []>} : vector<16x16xbf16>, vector<16x128xbf16>, vector<16x128xf32> -> vector<16x128xf32>
    %44 = arith.addf %42, %43 : vector<16x128xf32>
    %cst_14 = arith.constant 1.000000e+00 : f32
    %45 = vector.broadcast %cst_14 : f32 to vector<16x1xf32>
    %46 = arith.maximumf %36, %45 : vector<16x1xf32>
    %47 = tpu.reciprocal %46 : vector<16x1xf32> -> vector<16x1xf32>
    %cst_15 = arith.constant 0.000000e+00 : f32
    %48 = vector.broadcast %cst_15 : f32 to vector<16x1xf32>
    %49 = arith.cmpf ogt, %36, %48 : vector<16x1xf32>
    %50 = vector.broadcast %47 : vector<16x1xf32> to vector<16x128xf32>
    %51 = arith.mulf %44, %50 : vector<16x128xf32>
    %52 = vector.shape_cast %49 : vector<16x1xi1> to vector<16x1xi1>
    %53 = vector.broadcast %52 : vector<16x1xi1> to vector<16x128xi1>
    %54 = arith.select %53, %51, %27 : vector<16x128xi1>, vector<16x128xf32>
    %c2_i32 = arith.constant 2 : i32
    %55 = arith.index_cast %c2_i32 : i32 to index
    %c0_16 = arith.constant 0 : index
    %c0_17 = arith.constant 0 : index
    %56 = vector.load %arg1[%55, %c0_16, %c0_17] : memref<3x16x16xf32, #tpu.memory_space<vmem>>, vector<1x16x16xf32>
    %57 = vector.shape_cast %56 : vector<1x16x16xf32> to vector<16x16xf32>
    %cst_18 = arith.constant 0.000000e+00 : f32
    %58 = vector.broadcast %cst_18 : f32 to vector<16x16xf32>
    %59 = arith.cmpf ogt, %57, %58 : vector<16x16xf32>
    %60 = arith.extui %59 : vector<16x16xi1> to vector<16x16xi32>
    %61 = arith.sitofp %60 : vector<16x16xi32> to vector<16x16xf32>
    %cst_19 = arith.constant dense<0.000000e+00> : vector<16xf32>
    %62 = vector.multi_reduction <add>, %61, %cst_19 [1] : vector<16x16xf32> to vector<16xf32>
    %63 = vector.shape_cast %62 : vector<16xf32> to vector<16x1xf32>
    %64 = arith.truncf %61 : vector<16x16xf32> to vector<16x16xbf16>
    %65 = arith.truncf %54 : vector<16x128xf32> to vector<16x128xbf16>
    %66 = arith.extf %65 : vector<16x128xbf16> to vector<16x128xf32>
    %67 = arith.subf %54, %66 : vector<16x128xf32>
    %68 = arith.truncf %67 : vector<16x128xf32> to vector<16x128xbf16>
    %cst_20 = arith.constant dense<0.000000e+00> : vector<16x128xf32>
    %69 = tpu.matmul %64, %65, %cst_20 {dimension_numbers = #tpu.dot_dimension_numbers<[1], [0], [0], [1], [0, 0, 1, 1], [], []>} : vector<16x16xbf16>, vector<16x128xbf16>, vector<16x128xf32> -> vector<16x128xf32>
    %cst_21 = arith.constant dense<0.000000e+00> : vector<16x128xf32>
    %70 = tpu.matmul %64, %68, %cst_21 {dimension_numbers = #tpu.dot_dimension_numbers<[1], [0], [0], [1], [0, 0, 1, 1], [], []>} : vector<16x16xbf16>, vector<16x128xbf16>, vector<16x128xf32> -> vector<16x128xf32>
    %71 = arith.addf %69, %70 : vector<16x128xf32>
    %cst_22 = arith.constant 1.000000e+00 : f32
    %72 = vector.broadcast %cst_22 : f32 to vector<16x1xf32>
    %73 = arith.maximumf %63, %72 : vector<16x1xf32>
    %74 = tpu.reciprocal %73 : vector<16x1xf32> -> vector<16x1xf32>
    %cst_23 = arith.constant 0.000000e+00 : f32
    %75 = vector.broadcast %cst_23 : f32 to vector<16x1xf32>
    %76 = arith.cmpf ogt, %63, %75 : vector<16x1xf32>
    %77 = vector.broadcast %74 : vector<16x1xf32> to vector<16x128xf32>
    %78 = arith.mulf %71, %77 : vector<16x128xf32>
    %79 = vector.shape_cast %76 : vector<16x1xi1> to vector<16x1xi1>
    %80 = vector.broadcast %79 : vector<16x1xi1> to vector<16x128xi1>
    %81 = arith.select %80, %78, %54 : vector<16x128xi1>, vector<16x128xf32>
    %c3_i32 = arith.constant 3 : i32
    %c0_24 = arith.constant 0 : index
    %c0_25 = arith.constant 0 : index
    %82 = vector.load %arg3[%c0_24, %c0_25] : memref<16x128xf32, #tpu.memory_space<vmem>>, vector<16x128xf32>
    tpu.vector_store %arg3[%c0_24, %c0_25], %81 {strides = array<i32>} : memref<16x128xf32, #tpu.memory_space<vmem>>, vector<16x128xf32>,
    return
  }
  func.func @transform_0(%arg0: i32) -> (i32, i32, i32) {
    %c0_i32 = arith.constant 0 : i32
    %c0_i32_0 = arith.constant 0 : i32
    %c0_i32_1 = arith.constant 0 : i32
    %c0_i32_2 = arith.constant 0 : i32
    return %c0_i32, %c0_i32_0, %c0_i32_1 : i32, i32, i32
  }
  func.func @transform_1(%arg0: i32) -> (i32, i32) {
    %c0_i32 = arith.constant 0 : i32
    %c0_i32_0 = arith.constant 0 : i32
    %c0_i32_1 = arith.constant 0 : i32
    return %c0_i32, %c0_i32_0 : i32, i32
  }
  func.func @transform_2(%arg0: i32) -> (i32, i32) {
    %c0_i32 = arith.constant 0 : i32
    %c0_i32_0 = arith.constant 0 : i32
    %c0_i32_1 = arith.constant 0 : i32
    return %c0_i32, %c0_i32_0 : i32, i32
  }
}

</mosaic_0001>

<bundles_post_ra>
// kernel: tpu_custom_call.1
= control target key start
LH: loop header
LB: loop body
LE: loop exit
PB: predicated region body
PF: predicated region fallthrough
CT: control target
= control target key end

     0   :  { %7 = vsyncpa [#allocation3], 0  ;;  %s647_s0 = inlined_call_operand.hbm [shape: f32[3,16,16], index: 0, kind: input, shape index: {}]   ;;  %s648_s1 = inlined_call_operand.hbm [shape: f32[16,128], index: 1, kind: input, shape index: {}]   ;;  %s649_s2 = inlined_call_operand.hbm [shape: f32[16,128], index: 2, kind: output, shape index: {}]  }
   0x1   :  { %8 = vsyncpa [#allocation6], 0 }
   0x2   :  { %9 = vsyncpa [#allocation4], 0  ;;  %s571_s9 = smov [#allocation2]  }
   0x3   :  { %s15_s10 = sshll.u32 %s571_s9, 4  ;;  %s16_s10 = int_to_ptr.vmem [resolvable:$true] %s15_s10 }
   0x4   :  { %s513_s11 = scalar_lea.vmem %s16_s10, 768  ;;  %p518_p1 = scmp.lt.s32.totalorder %s16_s10, %s16_s10 }
   0x5   :  { %p514_p0 = scmp.ne.s32.totalorder %s16_s10, %s513_s11  ;;  %p519_p2 = scmp.lt.s32.totalorder %s513_s11, %s513_s11 }
   0x7   :  { %p520_p3 = por %p519_p2, %p518_p1 }
   0x9   :  { %p521_p4 = pnand %p520_p3, %p514_p0 }
   0xb   :  { %524 = shalt.err (!%p521_p4)
}
   0xc   :  { %s572_s12 = smov 128   ;;  %s573_s13 = smov 8  }
   0xd   :  { %21 = dma.hbm_to_vmem [thread:$0]  %s647_s0, 768, %s16_s10, [#allocation3], %s572_s12, %s572_s12, %s573_s13  }
   0xe   :  { %s574_s16 = smov [#allocation5]  }
   0xf   :  { %s27_s17 = sshll.u32 %s574_s16, 4  ;;  %s28_s17 = int_to_ptr.vmem [resolvable:$true] %s27_s17 }
  0x10   :  { %s533_s18 = scalar_lea.vmem %s28_s17, 256  ;;  %p538_p6 = scmp.lt.s32.totalorder %s28_s17, %s28_s17 }
  0x11   :  { %p534_p5 = scmp.ne.s32.totalorder %s28_s17, %s533_s18  ;;  %p539_p7 = scmp.lt.s32.totalorder %s533_s18, %s533_s18 }
  0x13   :  { %p540_p8 = por %p539_p7, %p538_p6 }
  0x15   :  { %p541_p9 = pnand %p540_p8, %p534_p5 }
  0x17   :  { %544 = shalt.err (!%p541_p9)
}
  0x18   :  { %33 = dma.hbm_to_vmem [thread:$0]  %s648_s1, 256, %s28_s17, [#allocation6], %s572_s12, %s572_s12, %s573_s13  }
  0x19   :  { %565 = dma.done.wait [#allocation3], 768  }
  0x1a   :  { %566 = vsyncadd [#allocation3], 4294966528 }
  0x1b   :  { %567 = dma.done.wait [#allocation6], 256  }
  0x1c   :  { %568 = vsyncadd [#allocation6], 4294967040  ;;  %v575_v0 = vmov 0.0   ;;  %vm576_vm0 = vmmov 0   ;;  %v41_v1 = vld [vmem:[#allocation5] sm:$0xff]  ;;  %v42_v2 = vld [vmem:[#allocation5 + $0x8] sm:$0xff] }
  0x1d   :  { %456 = vmatprep.subr.bf16.mxu1 %v575_v0  ;;  %458 = vmatprep.mubr.msk.bf16.mxu1 %vm576_vm0, %v575_v0  ;;  %v43_v3 = vld [vmem:[#allocation2] sm:$0xff]  ;;  %v59_v4 = vpack.c.bf16 %v42_v2, %v41_v1  ;;  %v44_v5 = vld [vmem:[#allocation2 + $0x8] sm:$0xff]  ;;  %vm51_vm3 = vcmask 130048   ;;  %v165_v16 = vld [vmem:[#allocation2 + $0x10] sm:$0xff]  ;;  %s577_s0 = smov [#allocation7]  }
  0x1e   :  { %450 = vmatprep.subr.bf16.mxu0 %v575_v0  ;;  %452 = vmatprep.mubr.msk.bf16.mxu0 %vm576_vm0, %v575_v0  ;;  %vm45_vm1 = vcmp.gt.f32.partialorder %v43_v3, 0.0  ;;  %vm46_vm2 = vcmp.gt.f32.partialorder %v44_v5, 0.0  ;;  %v166_v17 = vld [vmem:[#allocation2 + $0x18] sm:$0xff]  ;;  %vm167_vm4 = vcmp.gt.f32.partialorder %v165_v16, 0.0  ;;  %v286_v49 = vld [vmem:[#allocation2 + $0x20] sm:$0xff]  ;;  %v287_v50 = vld [vmem:[#allocation2 + $0x28] sm:$0xff] }
  0x1f   :  { %v426_v6 = vsel %vm45_vm1, 1.0, %v575_v0  ;;  %457 = vmatpush3.bf16.msra.mxu1 %v59_v4  ;;  %v427_v7 = vsel %vm46_vm2, 1.0, %v575_v0  ;;  %v60_v8 = vunpack.c.l.bf16 %v59_v4  ;;  %v61_v9 = vunpack.c.h.bf16 %v59_v4  ;;  %s413_s1 = sshll.u32 %s577_s0, 4  ;;  %s414_s1 = int_to_ptr.vmem [resolvable:$true] %s413_s1 }
  0x20   :  { %v52_v10 = vsel %vm51_vm3, %v426_v6, 0.0  ;;  %v58_v11 = vpack.c.bf16 %v427_v7, %v426_v6  ;;  %468 = vmatprep.subr.bf16.mxu1 %v575_v0  ;;  %v55_v14 = vsel %vm51_vm3, %v427_v7, 0.0  ;;  %vm168_vm5 = vcmp.gt.f32.partialorder %v166_v17, 0.0  ;;  %s545_s21 = scalar_lea.vmem %s414_s1, 256  ;;  %p550_p11 = scmp.lt.s32.totalorder %s414_s1, %s414_s1 }
  0x21   :  { %53 = vadd.xlane.f32.xlu0 %v52_v10  ;;  %v62_v12 = vsub.f32 %v41_v1, %v60_v8  ;;  %v63_v13 = vsub.f32 %v42_v2, %v61_v9  ;;  %v430_v18 = vsel %vm167_vm4, 1.0, %v575_v0  ;;  %v431_v19 = vsel %vm168_vm5, 1.0, %v575_v0  ;;  %p546_p10 = scmp.ne.s32.totalorder %s414_s1, %s545_s21  ;;  %p551_p12 = scmp.lt.s32.totalorder %s545_s21, %s545_s21 }
  0x22   :  { %459 = vmatmul.mubr.msk.bf16.vlgmr.msra.gmra.mxu1 %vm51_vm3, %v58_v11  ;;  %v179_v20 = vpack.c.bf16 %v431_v19, %v430_v18  ;;  %v173_v21 = vsel %vm51_vm3, %v430_v18, 0.0  ;;  %v176_v22 = vsel %vm51_vm3, %v431_v19, 0.0  ;;  %vm288_vm8 = vcmp.gt.f32.partialorder %v286_v49, 0.0 }
  0x23   :  { %v64_v15 = vpack.c.bf16 %v63_v13, %v62_v12  ;;  %470 = vmatprep.mubr.msk.bf16.mxu1 %vm576_vm0, %v575_v0  ;;  %174 = vadd.xlane.f32.xlu1 %v173_v21  ;;  %vm289_vm9 = vcmp.gt.f32.partialorder %v287_v50, 0.0  ;;  %v434_v51 = vsel %vm288_vm8, 1.0, %v575_v0  ;;  %p552_p13 = por %p551_p12, %p550_p11 }
  0x24   :  { %v435_v52 = vsel %vm289_vm9, 1.0, %v575_v0  ;;  %v294_v54 = vsel %vm51_vm3, %v434_v51, 0.0 }
  0x25   :  { %56 = vadd.xlane.f32.xlu0 %v55_v14  ;;  %451 = vmatpush3.bf16.msra.mxu0 %v64_v15  ;;  %v300_v53 = vpack.c.bf16 %v435_v52, %v434_v51  ;;  %v297_v55 = vsel %vm51_vm3, %v435_v52, 0.0  ;;  %p553_p0 = pnand %p552_p13, %p546_p10 }
  0x26   :  { %462 = vmatprep.subr.bf16.mxu0 %v575_v0 }
  0x27   :  { %177 = vadd.xlane.f32.xlu1 %v176_v22 }
  0x28   :  { %453 = vmatmul.mubr.msk.bf16.vlgmr.msra.gmra.mxu0 %vm51_vm3, %v58_v11 }
  0x29   :  { %464 = vmatprep.mubr.msk.bf16.mxu0 %vm576_vm0, %v575_v0  ;;  %295 = vadd.xlane.f32.xlu0 %v294_v54 }
  0x2b   :  { %298 = vadd.xlane.f32.xlu1 %v297_v55 }
  0xaa   :  { %v54_v23 = vpop.xlane.xlu0 %53 }
  0xab   :  { %v150_v25 = vmax.f32 %v54_v23, 1.0  ;;  %vm154_vm6 = vcmp.gt.f32.partialorder %v54_v23, 0.0 }
  0xac   :  { %v175_v56 = vpop.xlane.xlu1 %174 }
  0xad   :  { %493 = vrcp.f32 %v150_v25  ;;  %v271_v58 = vmax.f32 %v175_v56, 1.0  ;;  %vm275_vm10 = vcmp.gt.f32.partialorder %v175_v56, 0.0 }
  0xae   :  { %v57_v24 = vpop.xlane.xlu0 %56 }
  0xaf   :  { %v151_v26 = vmax.f32 %v57_v24, 1.0  ;;  %vm155_vm7 = vcmp.gt.f32.partialorder %v57_v24, 0.0 }
  0xb0   :  { %v178_v57 = vpop.xlane.xlu1 %177 }
  0xb1   :  { %495 = vrcp.f32 %v151_v26  ;;  %v272_v59 = vmax.f32 %v178_v57, 1.0  ;;  %vm276_vm11 = vcmp.gt.f32.partialorder %v178_v57, 0.0 }
  0xb2   :  { %497 = vrcp.f32 %v271_v58  ;;  %v296_v18 = vpop.xlane.xlu0 %295 }
  0xb3   :  { %499 = vrcp.f32 %v272_v59  ;;  %v392_v19 = vmax.f32 %v296_v18, 1.0  ;;  %vm396_vm12 = vcmp.gt.f32.partialorder %v296_v18, 0.0 }
  0xb5   :  { %501 = vrcp.f32 %v392_v19 }
  0xba   :  { %v494_v33 = vpop.eup %493 }
  0xbe   :  { %v496_v35 = vpop.eup %495 }
  0xe2   :  { %v143_v27 = vpop.f32.mrf.mxu1 }
  0xe4   :  { %v460_v28 = vpop.f32.mrf.mxu1 }
  0xe6   :  { %v146_v29 = vpop.f32.mrf.mxu1 }
  0xe8   :  { %v102_v30 = vpop.f32.mrf.mxu0  ;;  %v461_v31 = vpop.f32.mrf.mxu1 }
  0xe9   :  { %v144_v32 = vadd.f32 %v143_v27, %v102_v30 }
  0xea   :  { %v454_v34 = vpop.f32.mrf.mxu0 }
  0xeb   :  { %v156_v37 = vmul.f32 %v494_v33, %v144_v32 }
  0xec   :  { %v105_v36 = vpop.f32.mrf.mxu0 }
  0xed   :  { %v147_v38 = vadd.f32 %v146_v29, %v105_v36  ;;  %v162_v41 = vsel %vm154_vm6, %v156_v37, %v41_v1 }
  0xee   :  { %v455_v39 = vpop.f32.mrf.mxu0 }
  0xef   :  { %v157_v40 = vmul.f32 %v496_v35, %v147_v38 }
  0xf1   :  { %v163_v42 = vsel %vm155_vm7, %v157_v40, %v42_v2 }
  0xf2   :  { %v180_v43 = vpack.c.bf16 %v163_v42, %v162_v41 }
  0xf4   :  { %469 = vmatpush3.bf16.msra.mxu1 %v180_v43  ;;  %v181_v44 = vunpack.c.l.bf16 %v180_v43  ;;  %v182_v45 = vunpack.c.h.bf16 %v180_v43 }
  0xf5   :  { %480 = vmatprep.subr.bf16.mxu1 %v575_v0 }
  0xf6   :  { %v183_v46 = vsub.f32 %v162_v41, %v181_v44  ;;  %v184_v47 = vsub.f32 %v163_v42, %v182_v45 }
  0xf7   :  { %471 = vmatmul.mubr.msk.bf16.vlgmr.msra.gmra.mxu1 %vm51_vm3, %v179_v20 }
  0xf8   :  { %v185_v48 = vpack.c.bf16 %v184_v47, %v183_v46  ;;  %482 = vmatprep.mubr.msk.bf16.mxu1 %vm576_vm0, %v575_v0 }
  0xfa   :  { %463 = vmatpush3.bf16.msra.mxu0 %v185_v48 }
  0xfb   :  { %474 = vmatprep.subr.bf16.mxu0 %v575_v0 }
  0xfd   :  { %465 = vmatmul.mubr.msk.bf16.vlgmr.msra.gmra.mxu0 %vm51_vm3, %v179_v20  ;;  %v299_v20 = vpop.xlane.xlu1 %298 }
  0xfe   :  { %476 = vmatprep.mubr.msk.bf16.mxu0 %vm576_vm0, %v575_v0  ;;  %v498_v0 = vpop.eup %497  ;;  %v393_v21 = vmax.f32 %v299_v20, 1.0  ;;  %vm397_vm13 = vcmp.gt.f32.partialorder %v299_v20, 0.0 }
  0xff   :  { %v500_v4 = vpop.eup %499 }
 0x100   :  { %503 = vrcp.f32 %v393_v21  ;;  %v502_v25 = vpop.eup %501 }
 0x10d   :  { %v504_v31 = vpop.eup %503 }
 0x1b7   :  { %v264_v60 = vpop.f32.mrf.mxu1 }
 0x1b9   :  { %v472_v61 = vpop.f32.mrf.mxu1 }
 0x1bb   :  { %v267_v62 = vpop.f32.mrf.mxu1 }
 0x1bd   :  { %v223_v63 = vpop.f32.mrf.mxu0  ;;  %v473_v1 = vpop.f32.mrf.mxu1 }
 0x1be   :  { %v265_v2 = vadd.f32 %v264_v60, %v223_v63 }
 0x1bf   :  { %v466_v3 = vpop.f32.mrf.mxu0 }
 0x1c0   :  { %v277_v6 = vmul.f32 %v498_v0, %v265_v2 }
 0x1c1   :  { %v226_v5 = vpop.f32.mrf.mxu0 }
 0x1c2   :  { %v268_v7 = vadd.f32 %v267_v62, %v226_v5  ;;  %v283_v10 = vsel %vm275_vm10, %v277_v6, %v162_v41 }
 0x1c3   :  { %v467_v8 = vpop.f32.mrf.mxu0 }
 0x1c4   :  { %v278_v9 = vmul.f32 %v500_v4, %v268_v7 }
 0x1c6   :  { %v284_v11 = vsel %vm276_vm11, %v278_v9, %v163_v42 }
 0x1c7   :  { %v301_v12 = vpack.c.bf16 %v284_v11, %v283_v10 }
 0x1c9   :  { %481 = vmatpush3.bf16.msra.mxu1 %v301_v12  ;;  %v302_v13 = vunpack.c.l.bf16 %v301_v12  ;;  %v303_v14 = vunpack.c.h.bf16 %v301_v12 }
 0x1cb   :  { %v304_v15 = vsub.f32 %v283_v10, %v302_v13  ;;  %v305_v16 = vsub.f32 %v284_v11, %v303_v14 }
 0x1cc   :  { %483 = vmatmul.mubr.msk.bf16.vlgmr.msra.gmra.mxu1 %vm51_vm3, %v300_v53 }
 0x1cd   :  { %v306_v17 = vpack.c.bf16 %v305_v16, %v304_v15 }
 0x1cf   :  { %475 = vmatpush3.bf16.msra.mxu0 %v306_v17 }
 0x1d2   :  { %477 = vmatmul.mubr.msk.bf16.vlgmr.msra.gmra.mxu0 %vm51_vm3, %v300_v53 }
 0x28c   :  { %v385_v22 = vpop.f32.mrf.mxu1 }
 0x28e   :  { %v484_v23 = vpop.f32.mrf.mxu1 }
 0x290   :  { %v388_v24 = vpop.f32.mrf.mxu1 }
 0x292   :  { %v344_v26 = vpop.f32.mrf.mxu0  ;;  %v485_v27 = vpop.f32.mrf.mxu1 }
 0x293   :  { %v386_v28 = vadd.f32 %v385_v22, %v344_v26 }
 0x294   :  { %v478_v29 = vpop.f32.mrf.mxu0 }
 0x295   :  { %v398_v30 = vmul.f32 %v502_v25, %v386_v28 }
 0x296   :  { %v347_v32 = vpop.f32.mrf.mxu0 }
 0x297   :  { %v389_v33 = vadd.f32 %v388_v24, %v347_v32  ;;  %v404_v34 = vsel %vm396_vm12, %v398_v30, %v283_v10 }
 0x298   :  { %v479_v35 = vpop.f32.mrf.mxu0  ;;  %406 = vst [vmem:[#allocation7] sm:$0xff] %v404_v34 }
 0x299   :  { %v399_v36 = vmul.f32 %v504_v31, %v389_v33 }
 0x29b   :  { %v405_v37 = vsel %vm397_vm13, %v399_v36, %v284_v11 }
 0x29c   :  { %407 = vst [vmem:[#allocation7 + $0x8] sm:$0xff] %v405_v37 }
 0x29d   :  { %556 = shalt.err (!%p553_p0)
}
 0x29e   :  { %419 = dma.vmem_to_hbm [thread:$0]  %s414_s1, 256, %s649_s2, [#allocation4], %s572_s12, %s572_s12, %s573_s13  }
 0x29f   :  { %569 = dma.done.wait [#allocation4], 256  }
 0x2a0   :  { %570 = vsyncadd [#allocation4], 4294967040 }
 0x2a1   :  { %423 = vsyncpa [#allocation3], 1 }
 0x2a2   :  { %424 = vsyncpa [#allocation6], 1 }
 0x2a3   :  { %425 = vsyncpa [#allocation4], 1 }

</bundles_post_ra>
